<compile_context>
chip_gen: v7x
topology: tpu7x:2x2x1
jax: 0.10.0
libtpu: 0.0.40
codegen_flags: <defaults>
</compile_context>

<pallas_src>
import functools

import numpy as np
import jax
import jax.numpy as jnp
from jax.experimental import pallas as pl
from jax.experimental.pallas import tpu as pltpu


# ----------------------------- kernels --------------------------------------


def _copy_kernel(x_ref, o_ref):
    # Identity copy: the (g, cpg) group transpose is encoded entirely in the
    # input/output BlockSpec index maps.
    o_ref[...] = x_ref[...]


def _whole_image_shuffle_kernel(x_ref, o_ref, *, g, cpg):
    # x_ref / o_ref: (C, HW) for one image.  out[k*g + gi] = x[gi*cpg + k].
    # Row copies (static unroll or fori_loop) lower unconditionally on every
    # TPU generation; the HBM transfers for this path are full contiguous
    # (C, HW) slabs, so VMEM-side row granularity is not the bottleneck.
    c = g * cpg
    if c <= 256:
        for gi in range(g):
            for k in range(cpg):
                o_ref[k * g + gi, :] = x_ref[gi * cpg + k, :]
    else:
        def body(k, carry):
            for gi in range(g):
                o_ref[k * g + gi, :] = x_ref[gi * cpg + k, :]
            return carry
        jax.lax.fori_loop(0, cpg, body, 0)


# ----------------------------- helpers --------------------------------------


def _round_up(x: int, m: int) -> int:
    return ((x + m - 1) // m) * m


def _pick_spatial_factorization(hw: int):
    """Factor hw = S * L (sublane, lane) minimising (8, 128) padding waste.

    Ties prefer an unmasked lane dim (l % 128 == 0; the smallest such l, so the
    sublane axis stays large and splittable), otherwise the widest lane dim
    (smallest masked fraction of the last lane group).
    """
    best_key, best = None, (1, hw)
    for d in range(1, int(hw ** 0.5) + 1):
        if hw % d:
            continue
        for l in {d, hw // d}:
            s = hw // l
            waste = (_round_up(s, 8) / s) * (_round_up(l, 128) / l)
            key = (waste, 0 if l % 128 == 0 else 1, l if l % 128 == 0 else -l)
            if best_key is None or key < best_key:
                best_key, best = key, (s, l)
    return best


def _vmem_budget(block_bytes_cap, vmem_limit_bytes):
    """Generation-aware block / scoped-VMEM sizing (one code path for all chips)."""
    if block_bytes_cap is None or vmem_limit_bytes is None:
        try:
            info = pltpu.get_tpu_info()
            vmem_cap = int(getattr(info, "vmem_capacity_bytes", 64 * 1024 * 1024))
        except Exception:
            vmem_cap = 64 * 1024 * 1024          # conservative (v7x-sized) fallback
        if vmem_limit_bytes is None:
            # v5e/v6e (128 MiB physical) -> 64 MiB scoped; v7x (64 MiB) -> 48 MiB.
            vmem_limit_bytes = min(3 * vmem_cap // 4, 64 * 1024 * 1024)
        if block_bytes_cap is None:
            # 2 double-buffered operands (in + out) = 4x cap, kept under the limit.
            block_bytes_cap = min(vmem_limit_bytes // 5, 8 * 1024 * 1024)
    return block_bytes_cap, vmem_limit_bytes


# ----------------------------- wrapper ---------------------------------------


def channel_shuffle(x: jax.Array, n_groups: int, *,
                    block_bytes_cap: int | None = None,
                    vmem_limit_bytes: int | None = None,
                    small_hw_bytes: int = 1024) -> jax.Array:
    """Pallas-TPU forward pass of _ChannelShuffle (group count = n_groups)."""
    n, c, h, w = x.shape
    assert c % n_groups == 0, (
        f"Incompatible group size {n_groups} for input channel {c}")
    g = n_groups
    cpg = c // g
    if g == 1 or cpg == 1:
        return x                                  # the shuffle is the identity

    itemsize = np.dtype(x.dtype).itemsize
    hw = h * w
    block_bytes_cap, vmem_limit_bytes = _vmem_budget(block_bytes_cap, vmem_limit_bytes)

    # ---- Path A: small feature maps -> whole-image contiguous blocks --------
    c_pad, hw_pad = _round_up(c, 8), _round_up(hw, 128)
    if hw * itemsize <= small_hw_bytes and c_pad * hw_pad * itemsize <= block_bytes_cap:
        x3 = x.reshape(n, c, hw)
        out3 = pl.pallas_call(
            functools.partial(_whole_image_shuffle_kernel, g=g, cpg=cpg),
            out_shape=jax.ShapeDtypeStruct((n, c, hw), x.dtype),
            grid_spec=pltpu.PrefetchScalarGridSpec(
                num_scalar_prefetch=0,
                grid=(n,),
                in_specs=[pl.BlockSpec((None, c, hw), lambda i: (i, 0, 0))],
                out_specs=pl.BlockSpec((None, c, hw), lambda i: (i, 0, 0)),
            ),
            compiler_params=pltpu.CompilerParams(
                dimension_semantics=("parallel",),
                vmem_limit_bytes=vmem_limit_bytes,
            ),
        )(x3)
        return out3.reshape(n, c, h, w)

    # ---- Path B: BlockSpec-permutation identity copy -------------------------
    s, l = _pick_spatial_factorization(hw)
    l_pad = _round_up(l, 128)
    ch_bytes = _round_up(s, 8) * l_pad * itemsize      # one channel's padded VMEM cost

    if ch_bytes <= block_bytes_cap:
        sblk, ns = s, 1
        kblk = max(1, min(cpg, block_bytes_cap // ch_bytes))
        nk = pl.cdiv(cpg, kblk)
    else:
        # One channel alone exceeds the cap: keep kblk = 1 and split the
        # sublane (S) axis in multiples of 8 instead.  (If S == 1 the block
        # simply stays one whole channel — still correct, just above the cap.)
        kblk, nk = 1, cpg
        sblk = min(s, max(8, (block_bytes_cap // (l_pad * itemsize)) // 8 * 8))
        ns = pl.cdiv(s, sblk)

    x5 = x.reshape(n, g, cpg, s, l)
    nflat = n * g * nk        # flattened leading "parallel" axis (2-TC balance on v7x)

    def _decode(p):
        kc = p % nk
        t = p // nk
        return t // g, t % g, kc                  # (ni, gi, kc)

    def in_map(p, sc):
        ni, gi, kc = _decode(p)
        return (ni, gi, kc, sc, 0)

    def out_map(p, sc):
        ni, gi, kc = _decode(p)
        return (ni, kc, gi, sc, 0)

    out5 = pl.pallas_call(
        _copy_kernel,
        out_shape=jax.ShapeDtypeStruct((n, cpg, g, s, l), x.dtype),
        grid_spec=pltpu.PrefetchScalarGridSpec(
            num_scalar_prefetch=0,
            grid=(nflat, ns),
            # Last two block dims always equal the full view dims (sblk == s)
            # or are multiples of 8 x full-L, so the (8, 128) rule holds.
            in_specs=[pl.BlockSpec((None, None, kblk, sblk, l), in_map)],
            out_specs=pl.BlockSpec((None, kblk, None, sblk, l), out_map),
        ),
        compiler_params=pltpu.CompilerParams(
            dimension_semantics=("parallel", "parallel"),
            vmem_limit_bytes=vmem_limit_bytes,
        ),
    )(x5)

    # Free reshape of the contiguous (N, cpg, g, S, L) result back to NCHW.
    return out5.reshape(n, c, h, w)


def channel_shuffle_ref(x: jax.Array, n_groups: int) -> jax.Array:
    n, c, h, w = x.shape
    return (x.reshape(n, n_groups, c // n_groups, h, w)
             .transpose(0, 2, 1, 3, 4)
             .reshape(n, c, h, w))


if __name__ == "__main__":
    key = jax.random.PRNGKey(0)

    # Shapes implied by the module's forward: NCHW activations.
    N, C, H, W = 2, 4, 16, 16
    n_groups = 2                                  # `n_classes` acts as the group count

    x = jax.random.normal(key, (N, C, H, W), dtype=jnp.float32)
    out = jax.block_until_ready(channel_shuffle(x, n_groups))
    ref = channel_shuffle_ref(x, n_groups)
    assert out.shape == ref.shape and out.dtype == ref.dtype
    assert jnp.array_equal(out, ref), "channel shuffle mismatch vs reference"

    # Extra tiny cases exercising every code path (kept small for fast compiles).
    extra = [
        ((1, 6, 32, 32), 3, {}),                                  # Path B, HW % 128 == 0, odd g, N == 1
        ((2, 10, 28, 28), 2, dict(block_bytes_cap=8 * 1024)),     # Path B, ragged cdiv channel chunks, masked lanes
        ((1, 6, 64, 64), 3, dict(block_bytes_cap=4 * 1024)),      # Path B, sublane (S) split for oversized channels
        ((2, 12, 7, 7), 3, {}),                                   # Path A, tiny feature map, contiguous whole-image blocks
    ]
    for shape, grp, kw in extra:
        xi = jax.random.normal(jax.random.PRNGKey(1), shape, dtype=jnp.float32)
        oi = jax.block_until_ready(channel_shuffle(xi, grp, **kw))
        assert jnp.array_equal(oi, channel_shuffle_ref(xi, grp)), (shape, grp)

    print("KERNEL_OK")
</pallas_src>

<mosaic_0001>
module attributes {stable_mosaic.version = 11 : i64} {
  func.func @_whole_image_shuffle_kernel(%arg0: i32, %arg1: memref<1x4x256xf32, #tpu.memory_space<vmem>>, %arg2: memref<1x4x256xf32, #tpu.memory_space<vmem>>) attributes {dimension_semantics = [#tpu.dimension_semantics<parallel>], iteration_bounds = array<i64: 2>, scalar_prefetch = 0 : i64, scratch_operands = 0 : i64, tpu.core_type = #tpu.core_type<tc>, window_params = [{transform_indices = @transform_0, window_bounds = array<i64: 1, 4, 256>}, {transform_indices = @transform_1, window_bounds = array<i64: 1, 4, 256>}]} {
    %c0 = arith.constant 0 : index
    %c0_0 = arith.constant 0 : index
    %c0_1 = arith.constant 0 : index
    %0 = vector.load %arg1[%c0, %c0_0, %c0_1] : memref<1x4x256xf32, #tpu.memory_space<vmem>>, vector<1x1x256xf32>
    %1 = vector.shape_cast %0 : vector<1x1x256xf32> to vector<256xf32>
    %c0_2 = arith.constant 0 : index
    %c0_3 = arith.constant 0 : index
    %c0_4 = arith.constant 0 : index
    %2 = vector.load %arg2[%c0_2, %c0_3, %c0_4] : memref<1x4x256xf32, #tpu.memory_space<vmem>>, vector<1x1x256xf32>
    %3 = vector.shape_cast %2 : vector<1x1x256xf32> to vector<256xf32>
    %4 = vector.shape_cast %1 : vector<256xf32> to vector<1x1x256xf32>
    tpu.vector_store %arg2[%c0_2, %c0_3, %c0_4], %4 {strides = array<i32>} : memref<1x4x256xf32, #tpu.memory_space<vmem>>, vector<1x1x256xf32>,
    %c0_5 = arith.constant 0 : index
    %c1 = arith.constant 1 : index
    %c0_6 = arith.constant 0 : index
    %5 = vector.load %arg1[%c0_5, %c1, %c0_6] : memref<1x4x256xf32, #tpu.memory_space<vmem>>, vector<1x1x256xf32>
    %6 = vector.shape_cast %5 : vector<1x1x256xf32> to vector<256xf32>
    %c0_7 = arith.constant 0 : index
    %c2 = arith.constant 2 : index
    %c0_8 = arith.constant 0 : index
    %7 = vector.load %arg2[%c0_7, %c2, %c0_8] : memref<1x4x256xf32, #tpu.memory_space<vmem>>, vector<1x1x256xf32>
    %8 = vector.shape_cast %7 : vector<1x1x256xf32> to vector<256xf32>
    %9 = vector.shape_cast %6 : vector<256xf32> to vector<1x1x256xf32>
    tpu.vector_store %arg2[%c0_7, %c2, %c0_8], %9 {strides = array<i32>} : memref<1x4x256xf32, #tpu.memory_space<vmem>>, vector<1x1x256xf32>,
    %c0_9 = arith.constant 0 : index
    %c2_10 = arith.constant 2 : index
    %c0_11 = arith.constant 0 : index
    %10 = vector.load %arg1[%c0_9, %c2_10, %c0_11] : memref<1x4x256xf32, #tpu.memory_space<vmem>>, vector<1x1x256xf32>
    %11 = vector.shape_cast %10 : vector<1x1x256xf32> to vector<256xf32>
    %c0_12 = arith.constant 0 : index
    %c1_13 = arith.constant 1 : index
    %c0_14 = arith.constant 0 : index
    %12 = vector.load %arg2[%c0_12, %c1_13, %c0_14] : memref<1x4x256xf32, #tpu.memory_space<vmem>>, vector<1x1x256xf32>
    %13 = vector.shape_cast %12 : vector<1x1x256xf32> to vector<256xf32>
    %14 = vector.shape_cast %11 : vector<256xf32> to vector<1x1x256xf32>
    tpu.vector_store %arg2[%c0_12, %c1_13, %c0_14], %14 {strides = array<i32>} : memref<1x4x256xf32, #tpu.memory_space<vmem>>, vector<1x1x256xf32>,
    %c0_15 = arith.constant 0 : index
    %c3 = arith.constant 3 : index
    %c0_16 = arith.constant 0 : index
    %15 = vector.load %arg1[%c0_15, %c3, %c0_16] : memref<1x4x256xf32, #tpu.memory_space<vmem>>, vector<1x1x256xf32>
    %16 = vector.shape_cast %15 : vector<1x1x256xf32> to vector<256xf32>
    %c0_17 = arith.constant 0 : index
    %c3_18 = arith.constant 3 : index
    %c0_19 = arith.constant 0 : index
    %17 = vector.load %arg2[%c0_17, %c3_18, %c0_19] : memref<1x4x256xf32, #tpu.memory_space<vmem>>, vector<1x1x256xf32>
    %18 = vector.shape_cast %17 : vector<1x1x256xf32> to vector<256xf32>
    %19 = vector.shape_cast %16 : vector<256xf32> to vector<1x1x256xf32>
    tpu.vector_store %arg2[%c0_17, %c3_18, %c0_19], %19 {strides = array<i32>} : memref<1x4x256xf32, #tpu.memory_space<vmem>>, vector<1x1x256xf32>,
    return
  }
  func.func @transform_0(%arg0: i32) -> (i32, i32, i32) {
    %c0_i32 = arith.constant 0 : i32
    %c0_i32_0 = arith.constant 0 : i32
    %c0_i32_1 = arith.constant 0 : i32
    return %arg0, %c0_i32, %c0_i32_0 : i32, i32, i32
  }
  func.func @transform_1(%arg0: i32) -> (i32, i32, i32) {
    %c0_i32 = arith.constant 0 : i32
    %c0_i32_0 = arith.constant 0 : i32
    %c0_i32_1 = arith.constant 0 : i32
    return %arg0, %c0_i32, %c0_i32_0 : i32, i32, i32
  }
}

</mosaic_0001>

<bundles_post_ra>
// kernel: tpu_custom_call.1
= control target key start
LH: loop header
LB: loop body
LE: loop exit
PB: predicated region body
PF: predicated region fallthrough
CT: control target
= control target key end

     0   :  { %6 = vsyncpa [#allocation3], 0  ;;  %s575_s0 = inlined_call_operand.hbm [shape: f32[2,4,256], index: 0, kind: input, shape index: {}]   ;;  %s576_s1 = inlined_call_operand.hbm [shape: f32[2,4,256], index: 1, kind: output, shape index: {}]  }
   0x1   :  { %8 = vsyncpa [#allocation3 + $0x1], 0 }
   0x2   :  { %9 = vsyncpa [#allocation4], 0 }
   0x3   :  { %11 = vsyncpa [#allocation4 + $0x1], 0  ;;  %s414_s6 = smov 0   ;;  %s416_s7 = smov 0  }
   0x4   :  { %s418_s8 = smov 0   ;;  %s420_s9 = smov 0  }
   0x5 LB: > { %s435_s10 = sadd.s32 4294967295, %s400_s9   ;;  %s236_s11 = sadd.s32 4294967294, %s400_s9   ;;  %s400_s9 = sphi %s420_s9, %s591_s9   ;;  %s396_s8 = sphi %s418_s8, %s590_s8   ;;  %s392_s7 = sphi %s416_s7, %s589_s7   ;;  %s388_s6 = sphi %s414_s6, %s588_s6  }
   0x6   : > { %s439_s12 = sadd.s32 1, %s400_s9   ;;  %s24_s13 = sadd.s32 1, %s396_s8 }
   0x7   : > { %s21_s14 = ssub.s32 %s400_s9, %s439_s12  ;;  %p31_p0 = scmp.ne.s32.totalorder %s396_s8, %s392_s7 }
   0x8   : > { %p22_p1 = scmp.eq.s32.totalorder %s21_s14, 0  ;;  %p32_p2 = scmp.eq.s32.totalorder %s400_s9, 0 }
   0x9   : > { %p37_p3 = scmp.ne.s32.totalorder %s392_s7, %s388_s6  ;;  %p38_p4 = scmp.eq.s32.totalorder %s435_s10, 0 }
   0xa   : > { %s451_s15 = scalar_select %p22_p1, %s396_s8, %s24_s13  }
   0xb   : > { %p453_p5 = por %p32_p2, %p31_p0  ;;  %p457_p6 = por %p38_p4, %p37_p3 }
   0xc   : > { %p61_p7 = scmp.eq.s32.totalorder %s435_s10, 1  ;;  %p67_p8 = scmp.eq.s32.totalorder %s236_s11, 1 }
   0xd   : > { %p270_p10 = scmp.lt.s32.totalorder %s400_s9, 2  ;;  %s87_s20 = sand.u32 1, %s396_s8  }
   0xe   : > { %p464_p11 = por %p61_p7, %p31_p0  ;;  %p468_p12 = por %p67_p8, %p37_p3 }
   0xf   : > { %s256_s21 = sshll.u32 %s400_s9, 7  ;;  %s239_s22 = sshll.u32 %s87_s20, 3 }
  0x10   : > { %s580_s18 = scalar_select %p464_p11, 1, 0 }
  0x11   : > { %s581_s19 = scalar_select %p468_p12, 1, 0 }
  0x12   : > { %s477_s25 = scalar_lea.hbm %s575_s0, %s256_s21  ;;  %s91_s26 = scalar_lea.vmem [#allocation2], %s239_s22 }
  0x13   : > { %s99_s27 = sshll.u32 %s91_s26, 4  ;;  %p481_p13 = pnand %p270_p10, %p453_p5  ;;  %s485_s27 = int_to_ptr.vmem [resolvable:$true] %s99_s27 }
  0x14   : > { %s88_s29 = scalar_lea.sflag [#allocation3], %s87_s20  ;;  %s304_s30 = scalar_lea.hbm %s477_s25, 128 }
  0x15   : > { %p305_p2 = scmp.ne.s32.totalorder %s477_s25, %s304_s30  ;;  %p306_p3 = pneg %p481_p13 }
  0x16   : > { %s309_s4 = scalar_lea.hbm %s575_s0, 256  ;;  %p310_p5 = scmp.lt.u32.totalorder %s477_s25, %s575_s0 }
  0x17   : > { %p307_p4 = pnand %p306_p3, %p305_p2  ;;  %p311_p8 = scmp.lt.u32.totalorder %s309_s4, %s304_s30 }
  0x18   : > { %p313_p9 = scmp.lt.u32.totalorder %s304_s30, %s477_s25 }
  0x19   : > { %p308_p7 = pneg %p307_p4  ;;  %p312_p10 = por %p311_p8, %p310_p5 }
  0x1b   : > { %p314_p0 = por %p313_p9, %p312_p10 }
  0x1d   : > { %p315_p1 = pnand %p314_p0, %p308_p7 }
  0x1f   : > { %318 = shalt.err (!%p315_p1)
}
  0x20   : > { %s319_s13 = scalar_lea.vmem %s485_s27, 128  ;;  %s402_s14 = smov [#allocation2]  }
  0x21   : > { %p320_p2 = scmp.ne.s32.totalorder %s485_s27, %s319_s13  ;;  %s324_s16 = sshll.u32 %s402_s14, 4  ;;  %s325_s16 = int_to_ptr.vmem [resolvable:$false] %s324_s16 }
  0x22   : > { %s326_s20 = scalar_lea.vmem %s325_s16, 256  ;;  %p327_p11 = scmp.lt.s32.totalorder %s485_s27, %s325_s16 }
  0x23   : > { %p322_p4 = pnand %p320_p2, %p306_p3  ;;  %p328_p5 = scmp.lt.s32.totalorder %s326_s20, %s319_s13 }
  0x25   : > { %p323_p12 = pneg %p322_p4  ;;  %p329_p8 = por %p328_p5, %p327_p11 }
  0x27   : > { %p330_p9 = pnand %p329_p8, %p323_p12 }
  0x29   : > { %333 = shalt.err (!%p330_p9)
}
  0x2a   : > { %265 = dma.hbm_to_vmem [thread:$0]  (!%p481_p13), %s477_s25, 128, %s485_s27, %s88_s29  }
  0x2b   : > { %p583_p0 = scmp.lt.s32.totalorder %s400_s9, 3  ;;  %p584_p1 = scmp.ge.s32.totalorder %s400_s9, 1 }
  0x2d   : > { %p105_p3 = pnand %p584_p1, %p583_p0 }
  0x2e   : > { %s519_s21 = sand.u32 (!%p105_p3), 1, %s392_s7  }
  0x2f   : > { %108 = sbr.rel (%p105_p3) target bundleno = 82 (0x52), region = 24  ;;  %s243_s22 = sshll.u32 (!%p105_p3), %s519_s21, 3 }
  0x30   : > { %s111_s23 = scalar_lea.sflag (!%p105_p3), [#allocation3], %s519_s21  ;;  %s114_s24 = scalar_lea.vmem (!%p105_p3), [#allocation2], %s243_s22 }
  0x36   : > { %379 = dma.done.wait (%p457_p6), %s111_s23, 128  }
  0x37   : > { %381 = vsyncadd (%p457_p6), %s111_s23, 4294967168  ;;  %v134_v0 = vlaneseq  ;;  %s132_s25 = scalar_lea.vmem [#allocation5], %s243_s22  ;;  %s257_s27 = sshll.u32 %s435_s10, 7  ;;  %v133_v1 = vld [vmem:[%s114_s24] ss:$4 sm:$0x3] }
  0x38   : > { %s166_s26 = sshll.u32 %s132_s25, 4  ;;  %v245_v2 = vld [vmem:[%s114_s24 + $0x1] ss:$4 sm:$0x3]  ;;  %s533_s30 = scalar_lea.hbm %s576_s1, %s257_s27  ;;  %s528_s26 = int_to_ptr.vmem [resolvable:$true] %s166_s26 }
  0x39   : > { %vm136_vm0 = vcmp.lt.s32.totalorder %v134_v0, 256  ;;  %v247_v3 = vld [vmem:[%s114_s24 + $0x2] ss:$4 sm:$0x3]  ;;  %s152_s10 = scalar_lea.sflag [#allocation4], %s519_s21  ;;  %s334_s17 = scalar_lea.vmem %s528_s26, 128 }
  0x3a   : > { %138 = vst.msk [vmem:[%s132_s25] ss:$4 sm:$0x3] %vm136_vm0, %v133_v1  ;;  %246 = vst.msk [vmem:[%s132_s25 + $0x2] ss:$4 sm:$0x3] %vm136_vm0, %v245_v2  ;;  %p335_p6 = scmp.ne.s32.totalorder %s528_s26, %s334_s17 }
  0x3b   : > { %v249_v4 = vld [vmem:[%s114_s24 + $0x3] ss:$4 sm:$0x3]  ;;  %248 = vst.msk [vmem:[%s132_s25 + $0x1] ss:$4 sm:$0x3] %vm136_vm0, %v247_v3 }
  0x3c   : > { %250 = vst.msk [vmem:[%s132_s25 + $0x3] ss:$4 sm:$0x3] %vm136_vm0, %v249_v4  ;;  %p585_p11 = scmp.ne.s32.totalorder %s580_s18, 0  ;;  %s403_s2 = smov [#allocation5]  }
  0x3d   : > { %s338_s3 = sshll.u32 %s403_s2, 4  ;;  %s339_s3 = int_to_ptr.vmem [resolvable:$false] %s338_s3 }
  0x3e   : > { %p336_p12 = pnand %p335_p6, %p585_p11  ;;  %s340_s4 = scalar_lea.vmem %s339_s3, 256 }
  0x3f   : > { %p341_p7 = scmp.lt.s32.totalorder %s528_s26, %s339_s3  ;;  %p342_p10 = scmp.lt.s32.totalorder %s340_s4, %s334_s17 }
  0x40   : > { %p337_p13 = pneg %p336_p12 }
  0x41   : > { %p343_p2 = por %p342_p10, %p341_p7 }
  0x43   : > { %p344_p4 = pnand %p343_p2, %p337_p13 }
  0x45   : > { %347 = shalt.err (!%p344_p4)
}
  0x46   : > { %s348_s5 = scalar_lea.hbm %s533_s30, 128  ;;  %s352_s14 = scalar_lea.hbm %s576_s1, 256 }
  0x47   : > { %p349_p5 = scmp.ne.s32.totalorder %s533_s30, %s348_s5  ;;  %p353_p0 = scmp.lt.u32.totalorder %s533_s30, %s576_s1 }
  0x48   : > { %p354_p1 = scmp.lt.u32.totalorder %s352_s14, %s348_s5  ;;  %p356_p6 = scmp.lt.u32.totalorder %s348_s5, %s533_s30 }
  0x49   : > { %p350_p8 = pnand %p349_p5, %p585_p11 }
  0x4a   : > { %p355_p3 = por %p354_p1, %p353_p0 }
  0x4b   : > { %p351_p9 = pneg %p350_p8 }
  0x4c   : > { %p357_p12 = por %p356_p6, %p355_p3 }
  0x4e   : > { %p358_p13 = pnand %p357_p12, %p351_p9 }
  0x50   : > { %361 = shalt.err (!%p358_p13)
}
  0x51   : > { %260 = dma.vmem_to_hbm [thread:$0]  (%p585_p11), %s528_s26, 128, %s533_s30, %s152_s10  }
  0x52 PF: > { %s178_s21 = sand.u32 1, %s388_s6   ;;  %p586_p7 = scmp.ne.s32.totalorder %s581_s19, 0 }
  0x53   : > { %p587_p10 = scmp.ge.s32.totalorder %s400_s9, 2  ;;  %s179_s22 = scalar_lea.sflag [#allocation4], %s178_s21 }
  0x55   : > { %p267_p2 = pnand %p587_p10, %p586_p7 }
  0x57   : > { %383 = dma.done.wait (!%p267_p2), %s179_s22, 128  }
  0x58   : > { %385 = vsyncadd (!%p267_p2), %s179_s22, 4294967168  ;;  %p14_p4 = scmp.ge.s32.totalorder %s439_s12, 4   ;;  %s588_s6 = smov %s392_s7 }
  0x59   : > { %s589_s7 = smov %s396_s8  ;;  %s590_s8 = smov %s451_s15 }
  0x5a   : > { %s591_s9 = smov %s439_s12  ;;  %16 = sbr.rel (!%p14_p4) target bundleno = 5 (0x5), region = 75 }
  0x61   :  { %184 = vsyncpa [#allocation3], 1 }
  0x62   :  { %186 = vsyncpa [#allocation3 + $0x1], 1 }
  0x63   :  { %187 = vsyncpa [#allocation4], 1 }
  0x64   :  { %189 = vsyncpa [#allocation4 + $0x1], 1 }

</bundles_post_ra>
